<compile_context>
chip_gen: v7x
topology: tpu7x:2x2x1
jax: 0.10.0
libtpu: 0.0.40
codegen_flags: <defaults>
</compile_context>

<pallas_src>
import functools

import jax
import jax.numpy as jnp
import numpy as np
from jax.experimental import pallas as pl
from jax.experimental.pallas import tpu as pltpu


def _struct_att_kernel(*refs, has_mask):
    if has_mask:
        x_ref, bias_ref, w1_ref, w2_ref, out_ref, att_ref = refs
    else:
        x_ref, w1_ref, w2_ref, out_ref, att_ref = refs
        bias_ref = None

    L, BB, D = x_ref.shape

    # Single lane-layout-aware relayout to batch-major (replaces the old
    # BB-way strided-slice + concat).  The minor dim D is untouched.
    xb = pltpu.einshape("lbd->bld", x_ref[...])               # (BB, L, D)
    x2 = xb.reshape(BB * L, D)                                # free when L % 8 == 0

    w1 = w1_ref[...]
    w2 = w2_ref[...]

    # W1 slab matmul: operands in native dtype, f32 accumulation, tanh in f32.
    h = jnp.tanh(jnp.dot(x2, w1, preferred_element_type=jnp.float32))   # (BB*L, Hd)
    h = h.astype(w2.dtype)

    # Score matmul with the tiny (Hd, H) weight as the MXU-stationary RHS.
    s = jnp.dot(h, w2, preferred_element_type=jnp.float32)              # (BB*L, H)
    s = s.reshape(BB, L, x_ref.shape[0] and s.shape[-1])                # (BB, L, H)

    # One small relayout so L sits on the lane axis: softmax becomes a lane
    # reduction and the att store / tail matmul are lane-dense along L.
    st = jnp.transpose(s, (0, 2, 1))                                    # (BB, H, L) f32

    if has_mask:
        st = st - bias_ref[...]                 # (BB, 1, L) f32, broadcast over H

    # Vectorized softmax over len for the whole batch block at once.
    st = st - jnp.max(st, axis=-1, keepdims=True)
    e = jnp.exp(st)
    denom = jnp.sum(e, axis=-1, keepdims=True)                          # (BB, H, 1)
    inv = pl.reciprocal(denom, approx=True)                             # EUP slot
    inv = inv * (2.0 - denom * inv)                                     # 1 Newton step
    att = e * inv                                                       # (BB, H, L) f32

    # Tail matmul hoisted into a single batched dot per grid step:
    # (BB, H, L) @ (BB, L, D) -> (BB, H, D)   ('bqk,bkd->bqd' pattern).
    out = jax.lax.dot_general(
        att.astype(xb.dtype), xb,
        dimension_numbers=(((2,), (1,)), ((0,), (0,))),
        preferred_element_type=jnp.float32)

    # Full-block stores (no per-b masked partial writes).
    out_ref[...] = out.astype(out_ref.dtype)
    att_ref[...] = att.astype(att_ref.dtype)


def _vmem_capacity_bytes():
    try:
        info = pltpu.get_tpu_info()
        cap = getattr(info, "vmem_capacity_bytes", None)
        if cap:
            return int(cap)
    except Exception:
        pass
    return 128 * 1024 * 1024          # conservative default (v5e/v6e)


def _pick_batch_block(B, est_bytes, budget):
    """Largest batch block that fits the VMEM budget; prefer >=2 grid steps."""
    cands = [c for c in (32, 24, 16, 8) if B % c == 0]
    if not cands:
        if B <= 32:
            return B                  # single block covering the small/odd batch
        cands = [8]                   # large odd batch: pad up to multiples of 8
    fitting = [c for c in cands if est_bytes(c) <= budget] or [min(cands)]
    bb = max(fitting)
    if B == bb:                       # keep both v7x TensorCores busy if possible
        smaller = [c for c in fitting if c < bb and B % c == 0]
        if smaller:
            bb = max(smaller)
    return bb


def struct_attention(inpt, w1_t, w2_t, mask=None, block_b=None, compute_dtype=None):
    """
    inpt: [len, bsz, dim]   (torch layout, consumed directly, no wrapper transpose)
    mask: [len, bsz] or None
    w1_t: [dim, hid_dim]    (= W1.weight.T)
    w2_t: [hid_dim, head]   (= W2.weight.T)
    compute_dtype: optional MXU operand dtype (e.g. jnp.bfloat16); accumulation,
        tanh and softmax stay f32.  None = native dtype (bit-faithful test path).
    returns (outp [bsz, head, dim], att [bsz, head, len])
    """
    L, B, D = inpt.shape
    Hd = w1_t.shape[1]
    H = w2_t.shape[1]
    has_mask = mask is not None

    out_dtype = inpt.dtype
    x, w1, w2 = inpt, w1_t, w2_t
    if compute_dtype is not None:
        x = x.astype(compute_dtype)
        w1 = w1.astype(compute_dtype)
        w2 = w2.astype(compute_dtype)
    itemsize = jnp.dtype(x.dtype).itemsize
    out_isz = jnp.dtype(out_dtype).itemsize

    vmem_cap = _vmem_capacity_bytes()

    def est_bytes(bb):
        return (3 * L * bb * D * itemsize               # x block (2x pipeline) + b-major slab
                + L * bb * Hd * 4                       # hid (f32)
                + 2 * L * bb * max(H, 8) * 4            # scores + att (f32)
                + 2 * bb * H * (D + L) * out_isz        # double-buffered output blocks
                + (D * Hd + Hd * H) * itemsize          # weights
                + (2 * bb * L * 4 if has_mask else 0))  # mask bias blocks

    BB = block_b if block_b is not None else _pick_batch_block(
        B, est_bytes, int(0.70 * vmem_cap))

    bias = None
    if has_mask:
        # Hoist (1 - mask) * 1e10 out of the kernel; tiny f32 [B, 1, L] tensor.
        bias = ((1.0 - mask.astype(jnp.float32)) * 1e10).T[:, None, :]

    B_pad = B
    if B % BB != 0:
        pad = BB - B % BB
        B_pad = B + pad
        x = jnp.pad(x, ((0, 0), (0, pad), (0, 0)))
        if has_mask:
            bias = jnp.pad(bias, ((0, pad), (0, 0), (0, 0)))

    grid = (B_pad // BB,)

    in_specs = [pl.BlockSpec((L, BB, D), lambda g: (0, g, 0))]     # x, native layout
    inputs = [x]
    if has_mask:
        in_specs.append(pl.BlockSpec((BB, 1, L), lambda g: (g, 0, 0)))
        inputs.append(bias)
    in_specs += [
        pl.BlockSpec((D, Hd), lambda g: (0, 0)),   # W1^T, replicated (constant index map)
        pl.BlockSpec((Hd, H), lambda g: (0, 0)),   # W2^T, replicated
    ]
    inputs += [w1, w2]

    out_shapes = (
        jax.ShapeDtypeStruct((B_pad, H, D), out_dtype),
        jax.ShapeDtypeStruct((B_pad, H, L), out_dtype),
    )
    out_specs = [
        pl.BlockSpec((BB, H, D), lambda g: (g, 0, 0)),
        pl.BlockSpec((BB, H, L), lambda g: (g, 0, 0)),
    ]

    # Generation-aware VMEM limit with headroom below the physical capacity
    # (~54 MiB on v7x's 64 MiB, ~108 MiB on v5e/v6e's 128 MiB).
    vmem_limit = int(min(0.85 * vmem_cap,
                         max(2.5 * est_bytes(BB), 32 * 1024 * 1024)))

    cost = pl.CostEstimate(
        flops=int(2 * B_pad * L * (D * Hd + Hd * H + H * D)),
        transcendentals=int(B_pad * L * (Hd + H)),
        bytes_accessed=int(L * B_pad * D * itemsize
                           + (D * Hd + Hd * H) * itemsize
                           + B_pad * H * (D + L) * out_isz
                           + (B_pad * L * 4 if has_mask else 0)),
    )

    grid_spec = pltpu.PrefetchScalarGridSpec(
        num_scalar_prefetch=0, grid=grid, in_specs=in_specs, out_specs=out_specs)

    outp, att = pl.pallas_call(
        functools.partial(_struct_att_kernel, has_mask=has_mask),
        out_shape=out_shapes,
        grid_spec=grid_spec,
        cost_estimate=cost,
        compiler_params=pltpu.CompilerParams(
            dimension_semantics=("parallel",),
            vmem_limit_bytes=vmem_limit),
    )(*inputs)

    if B_pad != B:
        outp = outp[:B]
        att = att[:B]
    return outp, att


def _reference(inpt, w1_t, w2_t, mask=None):
    """Pure-JAX mirror of the torch forward."""
    h = jnp.tanh(jnp.einsum("lbd,dh->lbh", inpt, w1_t))
    s = jnp.einsum("lbh,hk->lbk", h, w2_t)                 # [len, bsz, head]
    if mask is not None:
        m = mask.astype(jnp.float32)[..., None]            # [len, bsz, 1]
        s = s - (1.0 - m) * 1e10
    att = jax.nn.softmax(s, axis=0)                        # softmax over len
    att = jnp.transpose(att, (1, 2, 0))                    # [bsz, head, len]
    outp = att @ jnp.transpose(inpt, (1, 0, 2))            # [bsz, head, dim]
    return outp, att


def _run_case(key, L, B, D, Hd, H, with_mask, block_b=None):
    k_x, k_w1, k_w2, k_m = jax.random.split(key, 4)
    inpt = jax.random.normal(k_x, (L, B, D), dtype=jnp.float32)

    # Xavier-normal init (std = sqrt(2/(fan_in+fan_out))), stored transposed.
    std1 = float(np.sqrt(2.0 / (D + Hd)))
    std2 = float(np.sqrt(2.0 / (Hd + H)))
    w1_t = jax.random.normal(k_w1, (D, Hd), dtype=jnp.float32) * std1
    w2_t = jax.random.normal(k_w2, (Hd, H), dtype=jnp.float32) * std2

    mask = None
    if with_mask:
        mask = (jax.random.uniform(k_m, (L, B)) > 0.2).astype(jnp.float32)

    outp, att = struct_attention(inpt, w1_t, w2_t, mask, block_b=block_b)
    jax.block_until_ready((outp, att))

    ref_out, ref_att = _reference(inpt, w1_t, w2_t, mask)
    assert outp.shape == (B, H, D) and att.shape == (B, H, L)
    np.testing.assert_allclose(np.asarray(outp), np.asarray(ref_out),
                               rtol=2e-5, atol=2e-5)
    np.testing.assert_allclose(np.asarray(att), np.asarray(ref_att),
                               rtol=2e-5, atol=2e-5)


if __name__ == "__main__":
    key = jax.random.PRNGKey(0)
    k1, k2, k3 = jax.random.split(key, 3)

    # Small masked case (single batch block, BB == B).
    _run_case(k1, L=8, B=2, D=32, Hd=32, H=2, with_mask=True)
    # Multi-block case: grid of 2 steps (BB=8), with mask, aligned dims.
    _run_case(k2, L=16, B=16, D=128, Hd=64, H=4, with_mask=True, block_b=8)
    # mask=None specialisation path.
    _run_case(k3, L=8, B=2, D=32, Hd=32, H=2, with_mask=False)

    print("KERNEL_OK")
</pallas_src>

<mosaic_0001>
module attributes {stable_mosaic.version = 11 : i64} {
  func.func @_struct_att_kernel(%arg0: i32, %arg1: memref<8x2x32xf32, #tpu.memory_space<vmem>>, %arg2: memref<2x1x8xf32, #tpu.memory_space<vmem>>, %arg3: memref<32x32xf32, #tpu.memory_space<vmem>>, %arg4: memref<32x2xf32, #tpu.memory_space<vmem>>, %arg5: memref<2x2x32xf32, #tpu.memory_space<vmem>>, %arg6: memref<2x2x8xf32, #tpu.memory_space<vmem>>) attributes {dimension_semantics = [#tpu.dimension_semantics<parallel>], iteration_bounds = array<i64: 1>, scalar_prefetch = 0 : i64, scratch_operands = 0 : i64, tpu.core_type = #tpu.core_type<tc>, window_params = [{transform_indices = @transform_0, window_bounds = array<i64: 8, 2, 32>}, {transform_indices = @transform_1, window_bounds = array<i64: 2, 1, 8>}, {pipeline_mode = #tpu.pipeline_mode<synchronous>, transform_indices = @transform_2, window_bounds = array<i64: 32, 32>}, {pipeline_mode = #tpu.pipeline_mode<synchronous>, transform_indices = @transform_3, window_bounds = array<i64: 32, 2>}, {transform_indices = @transform_4, window_bounds = array<i64: 2, 2, 32>}, {transform_indices = @transform_5, window_bounds = array<i64: 2, 2, 8>}]} {
    %c0 = arith.constant 0 : index
    %c0_0 = arith.constant 0 : index
    %c0_1 = arith.constant 0 : index
    %0 = vector.load %arg1[%c0, %c0_0, %c0_1] : memref<8x2x32xf32, #tpu.memory_space<vmem>>, vector<8x2x32xf32>
    %1 = tpu.transpose %0, [1, 0, 2] : vector<8x2x32xf32> -> vector<2x8x32xf32>
    %2 = vector.shape_cast %1 : vector<2x8x32xf32> to vector<16x32xf32>
    %c0_2 = arith.constant 0 : index
    %c0_3 = arith.constant 0 : index
    %3 = vector.load %arg3[%c0_2, %c0_3] : memref<32x32xf32, #tpu.memory_space<vmem>>, vector<32x32xf32>
    %c0_4 = arith.constant 0 : index
    %c0_5 = arith.constant 0 : index
    %4 = vector.load %arg4[%c0_4, %c0_5] : memref<32x2xf32, #tpu.memory_space<vmem>>, vector<32x2xf32>
    %cst = arith.constant dense<0.000000e+00> : vector<16x32xf32>
    %5 = tpu.matmul %2, %3, %cst {dimension_numbers = #tpu.dot_dimension_numbers<[1], [0], [0], [1], [0, 0, 1, 1], [], []>} : vector<16x32xf32>, vector<32x32xf32>, vector<16x32xf32> -> vector<16x32xf32>
    %6 = math.tanh %5 : vector<16x32xf32>
    %cst_6 = arith.constant dense<0.000000e+00> : vector<16x2xf32>
    %7 = tpu.matmul %6, %4, %cst_6 {dimension_numbers = #tpu.dot_dimension_numbers<[1], [0], [0], [1], [0, 0, 1, 1], [], []>} : vector<16x32xf32>, vector<32x2xf32>, vector<16x2xf32> -> vector<16x2xf32>
    %8 = vector.shape_cast %7 : vector<16x2xf32> to vector<2x8x2xf32>
    %9 = tpu.transpose %8, [0, 2, 1] : vector<2x8x2xf32> -> vector<2x2x8xf32>
    %c0_7 = arith.constant 0 : index
    %c0_8 = arith.constant 0 : index
    %c0_9 = arith.constant 0 : index
    %10 = vector.load %arg2[%c0_7, %c0_8, %c0_9] : memref<2x1x8xf32, #tpu.memory_space<vmem>>, vector<2x1x8xf32>
    %11 = vector.broadcast %10 : vector<2x1x8xf32> to vector<2x2x8xf32>
    %12 = arith.subf %9, %11 : vector<2x2x8xf32>
    %cst_10 = arith.constant dense<0xFF800000> : vector<2x2xf32>
    %13 = vector.multi_reduction <maximumf>, %12, %cst_10 [2] : vector<2x2x8xf32> to vector<2x2xf32>
    %14 = vector.shape_cast %13 : vector<2x2xf32> to vector<2x2x1xf32>
    %15 = vector.broadcast %14 : vector<2x2x1xf32> to vector<2x2x8xf32>
    %16 = arith.subf %12, %15 : vector<2x2x8xf32>
    %17 = math.exp %16 : vector<2x2x8xf32>
    %cst_11 = arith.constant dense<0.000000e+00> : vector<2x2xf32>
    %18 = vector.multi_reduction <add>, %17, %cst_11 [2] : vector<2x2x8xf32> to vector<2x2xf32>
    %19 = vector.shape_cast %18 : vector<2x2xf32> to vector<2x2x1xf32>
    %20 = tpu.reciprocal %19 {approx = true} : vector<2x2x1xf32> -> vector<2x2x1xf32>
    %21 = arith.mulf %19, %20 : vector<2x2x1xf32>
    %cst_12 = arith.constant 2.000000e+00 : f32
    %22 = vector.broadcast %cst_12 : f32 to vector<2x2x1xf32>
    %23 = arith.subf %22, %21 : vector<2x2x1xf32>
    %24 = arith.mulf %20, %23 : vector<2x2x1xf32>
    %25 = vector.broadcast %24 : vector<2x2x1xf32> to vector<2x2x8xf32>
    %26 = arith.mulf %17, %25 : vector<2x2x8xf32>
    %cst_13 = arith.constant dense<0.000000e+00> : vector<2x2x32xf32>
    %27 = tpu.matmul %26, %1, %cst_13 {dimension_numbers = #tpu.dot_dimension_numbers<[2], [1], [1], [2], [0, 0, 0, 1, 1, 2], [0], [0]>} : vector<2x2x8xf32>, vector<2x8x32xf32>, vector<2x2x32xf32> -> vector<2x2x32xf32>
    %c0_14 = arith.constant 0 : index
    %c0_15 = arith.constant 0 : index
    %c0_16 = arith.constant 0 : index
    %28 = vector.load %arg5[%c0_14, %c0_15, %c0_16] : memref<2x2x32xf32, #tpu.memory_space<vmem>>, vector<2x2x32xf32>
    tpu.vector_store %arg5[%c0_14, %c0_15, %c0_16], %27 {strides = array<i32>} : memref<2x2x32xf32, #tpu.memory_space<vmem>>, vector<2x2x32xf32>,
    %c0_17 = arith.constant 0 : index
    %c0_18 = arith.constant 0 : index
    %c0_19 = arith.constant 0 : index
    %29 = vector.load %arg6[%c0_17, %c0_18, %c0_19] : memref<2x2x8xf32, #tpu.memory_space<vmem>>, vector<2x2x8xf32>
    tpu.vector_store %arg6[%c0_17, %c0_18, %c0_19], %26 {strides = array<i32>} : memref<2x2x8xf32, #tpu.memory_space<vmem>>, vector<2x2x8xf32>,
    return
  }
  func.func @transform_0(%arg0: i32) -> (i32, i32, i32) {
    %c0_i32 = arith.constant 0 : i32
    %c0_i32_0 = arith.constant 0 : i32
    %c0_i32_1 = arith.constant 0 : i32
    return %c0_i32, %arg0, %c0_i32_0 : i32, i32, i32
  }
  func.func @transform_1(%arg0: i32) -> (i32, i32, i32) {
    %c0_i32 = arith.constant 0 : i32
    %c0_i32_0 = arith.constant 0 : i32
    %c0_i32_1 = arith.constant 0 : i32
    return %arg0, %c0_i32, %c0_i32_0 : i32, i32, i32
  }
  func.func @transform_2(%arg0: i32) -> (i32, i32) {
    %c0_i32 = arith.constant 0 : i32
    %c0_i32_0 = arith.constant 0 : i32
    %c0_i32_1 = arith.constant 0 : i32
    return %c0_i32, %c0_i32_0 : i32, i32
  }
  func.func @transform_3(%arg0: i32) -> (i32, i32) {
    %c0_i32 = arith.constant 0 : i32
    %c0_i32_0 = arith.constant 0 : i32
    %c0_i32_1 = arith.constant 0 : i32
    return %c0_i32, %c0_i32_0 : i32, i32
  }
  func.func @transform_4(%arg0: i32) -> (i32, i32, i32) {
    %c0_i32 = arith.constant 0 : i32
    %c0_i32_0 = arith.constant 0 : i32
    %c0_i32_1 = arith.constant 0 : i32
    return %arg0, %c0_i32, %c0_i32_0 : i32, i32, i32
  }
  func.func @transform_5(%arg0: i32) -> (i32, i32, i32) {
    %c0_i32 = arith.constant 0 : i32
    %c0_i32_0 = arith.constant 0 : i32
    %c0_i32_1 = arith.constant 0 : i32
    return %arg0, %c0_i32, %c0_i32_0 : i32, i32, i32
  }
}

</mosaic_0001>

<bundles_post_ra>
// kernel: tpu_custom_call.1
= control target key start
LH: loop header
LB: loop body
LE: loop exit
PB: predicated region body
PF: predicated region fallthrough
CT: control target
= control target key end

     0   :  { %11 = vsyncpa [#allocation3], 0  ;;  %s856_s0 = inlined_call_operand.hbm [shape: f32[8,2,32], index: 0, kind: input, shape index: {}]   ;;  %s857_s1 = inlined_call_operand.vmem [shape: f32[2,1,8], index: 1, kind: input, shape index: {}]   ;;  %s858_s2 = inlined_call_operand.vmem [shape: f32[32,32], index: 2, kind: input, shape index: {}]   ;;  %s859_s3 = inlined_call_operand.vmem [shape: f32[32,2], index: 3, kind: input, shape index: {}]   ;;  %s860_s4 = inlined_call_operand.hbm [shape: f32[2,2,32], index: 4, kind: output, shape index: {0}]   ;;  %s861_s5 = inlined_call_operand.hbm [shape: f32[2,2,8], index: 5, kind: output, shape index: {1}]  }
   0x1   :  { %12 = vsyncpa [#allocation4], 0 }
   0x2   :  { %13 = vsyncpa [#allocation7], 0  ;;  %s733_s18 = smov [#allocation2]   ;;  %s661_s22 = scalar_lea.hbm %s856_s0, 256 }
   0x3   :  { %s19_s19 = sshll.u32 %s733_s18, 4  ;;  %p662_p0 = scmp.ne.s32.totalorder %s856_s0, %s661_s22  ;;  %s20_s19 = int_to_ptr.vmem [resolvable:$true] %s19_s19 }
   0x4   :  { %p665_p1 = scmp.lt.u32.totalorder %s661_s22, %s856_s0 }
   0x6   :  { %p667_p2 = pnand %p665_p1, %p662_p0 }
   0x8   :  { %670 = shalt.err (!%p667_p2)
}
   0x9   :  { %s671_s27 = scalar_lea.vmem %s20_s19, 256  ;;  %p676_p4 = scmp.lt.s32.totalorder %s20_s19, %s20_s19 }
   0xa   :  { %p672_p3 = scmp.ne.s32.totalorder %s20_s19, %s671_s27  ;;  %p677_p5 = scmp.lt.s32.totalorder %s671_s27, %s671_s27 }
   0xc   :  { %p678_p6 = por %p677_p5, %p676_p4 }
   0xe   :  { %p679_p7 = pnand %p678_p6, %p672_p3 }
  0x10   :  { %682 = shalt.err (!%p679_p7)
}
  0x11   :  { %s734_s28 = smov 32   ;;  %s735_s29 = smov 2  }
  0x12   :  { %25 = dma.hbm_to_vmem [thread:$0]  %s856_s0, 256, %s20_s19, [#allocation3], %s734_s28, %s734_s28, %s735_s29  }
  0x13   :  { %727 = dma.done.wait [#allocation3], 256  }
  0x14   :  { %728 = vsyncadd [#allocation3], 4294967040  ;;  %v47_v0 = vlaneseq  ;;  %v736_v2 = vmov 1934713408   ;;  %v93_v4 = vld [vmem:[%s858_s2] sm:$0xff]  ;;  %v94_v5 = vld [vmem:[%s858_s2 + $0x8] sm:$0xff] }
  0x15   :  { %v77_v3 = vunpack.c.l.s4 %v736_v2  ;;  %v95_v6 = vld [vmem:[%s858_s2 + $0x10] sm:$0xff]  ;;  %v616_v7 = vpack.c.bf16 %v94_v5, %v93_v4  ;;  %v96_v8 = vld [vmem:[%s858_s2 + $0x18] sm:$0xff]  ;;  %v657_v11 = vld.sshfl [vmem:[#allocation2] sm:$0xf pattern:$0x76325410] }
  0x16   :  { %v48_v1 = vshrl.u32 %v47_v0, 7  ;;  %v620_v9 = vpack.c.bf16 %v96_v8, %v95_v6  ;;  %v658_v12 = vld.sshfl [vmem:[#allocation2 + $0x2] sm:$0xf pattern:$0x76325410]  ;;  %vm101_vm0 = vcmask 261120  }
  0x17   :  { %v78_v10 = vunpack.c.0.s8 %v77_v3  ;;  %617 = vmatprep.subr.bf16.mxu0 %v616_v7  ;;  %v659_v13 = vld.sshfl [vmem:[#allocation2 + $0x8] sm:$0xf pattern:$0x76325410]  ;;  %v75_v16 = vcombine.low %v657_v11, %v658_v12  ;;  %v97_v22 = vld [vmem:[%s859_s3] sm:$0xff]  ;;  %v99_v24 = vld [vmem:[%s859_s3 + $0x10] sm:$0xff] }
  0x18   :  { %619 = vmatpush3.bf16.msra.mxu0 %v616_v7  ;;  %v660_v14 = vld.sshfl [vmem:[#allocation2 + $0xa] sm:$0xf pattern:$0x76325410]  ;;  %v100_v26 = vld [vmem:[%s859_s3 + $0x18] sm:$0xff]  ;;  %vm346_vm1 = vcmask 58368  }
  0x19   :  { %621 = vmatprep.subr.bf16.mxu0 %v620_v9  ;;  %v81_v15 = vsub.s32 %v78_v10, %v48_v1  ;;  %v83_v17 = vcombine.low %v659_v13, %v660_v14  ;;  %v98_v23 = vld [vmem:[%s859_s3 + $0x8] sm:$0xff]  ;;  %v628_v27 = vpack.c.bf16 %v100_v26, %v99_v24  ;;  %v564_v34 = vld [vmem:[%s857_s1] ss:$0 sm:$0xff]  ;;  %v565_v37 = vld [vmem:[%s857_s1 + $0x1] ss:$0 sm:$0xff]  ;;  %v737_v52 = vmov 0.0  }
  0x1a   :  { %v624_v25 = vpack.c.bf16 %v98_v23, %v97_v22  ;;  %vm738_vm2 = vmmov 0   ;;  %vm375_vm3 = vcmask 64512   ;;  %s739_s1 = smov [#allocation6]  }
  0x1b   :  { %v82_v18 = vrot.slane %v75_v16, %v81_v15  ;;  %v90_v19 = vrot.slane %v83_v17, %v81_v15  ;;  %s544_s24 = sshll.u32 %s739_s1, 4  ;;  %s545_s24 = int_to_ptr.vmem [resolvable:$true] %s544_s24 }
  0x1c   :  { %623 = vmatpush3.bf16.msra.mxu0 %v620_v9  ;;  %625 = vmatprep.subr.bf16.mxu1 %v624_v25  ;;  %s683_s25 = scalar_lea.vmem %s545_s24, 64  ;;  %p688_p9 = scmp.lt.s32.totalorder %s545_s24, %s545_s24 }
  0x1d   :  { %v91_v20 = vcombine.low %v82_v18, %v90_v19  ;;  %v92_v21 = vcombine.high %v82_v18, %v90_v19  ;;  %627 = vmatpush3.bf16.msra.mxu1 %v624_v25  ;;  %606 = vmatprep.subr.mxu0 %v737_v52  ;;  %p684_p8 = scmp.ne.s32.totalorder %s545_s24, %s683_s25  ;;  %p689_p10 = scmp.lt.s32.totalorder %s683_s25, %s683_s25 }
  0x1e   :  { %629 = vmatprep.subr.bf16.mxu1 %v628_v27 }
  0x1f   :  { %592 = vmatprep.mubr.msk.f32.mxu0 %vm101_vm0, %v91_v20  ;;  %p690_p11 = por %p689_p10, %p688_p9 }
  0x20   :  { %593 = vmatmul.mubr.msk.f32.vlgmr.msra.gmra.mrb[0].mxu0 %vm101_vm0, %v92_v21 }
  0x21   :  { %631 = vmatpush3.bf16.msra.mxu1 %v628_v27  ;;  %607 = vmatpush3.msra.mxu0 %v91_v20  ;;  %p691_p12 = pnand %p690_p11, %p684_p8 }
  0x22   :  { %611 = vmatprep.subr.mxu1 %v737_v52  ;;  %608 = vmatprep.mubr.msk.f32.mxu0 %vm738_vm2, %v737_v52 }
  0xf3   :  { %v594_v28 = vpop.f32.mrb[0].mxu0 }
  0xf4   :  { %v174_v29 = vpop.f32.mrb[1].mxu0 }
  0xf5   :  { %645 = vtanh.f32 %v174_v29 }
  0xf6   :  { %647 = vtanh.f32 %v594_v28 }
  0xff   :  { %v646_v30 = vpop.eup %645 }
 0x100   :  { %v648_v31 = vpop.eup %647  ;;  %603 = vmatprep.mubr.msk.f32.mxu1 %vm101_vm0, %v646_v30 }
 0x101   :  { %604 = vmatmul.mubr.msk.f32.vlgmr.msra.gmra.mrb[0].mxu1 %vm101_vm0, %v648_v31 }
 0x102   :  { %612 = vmatpush3.msra.mxu1 %v92_v21  ;;  %613 = vmatprep.mubr.msk.f32.mxu1 %vm738_vm2, %v737_v52 }
 0x1d4   :  { %v605_v32 = vpop.f32.mrb[0].mxu1 }
 0x1d5   :  { %v257_v33 = vpop.f32.mrb[1].mxu1 }
 0x1d6   :  { %266 = vxpose.xlu0.b32.start.end [1/1] (short) (narrow) %v257_v33, 8 }
 0x1da   :  { %298 = vxpose.xlu0.b32.start.end [1/1] (short) (narrow) %v605_v32, 8 }
 0x256   :  { %v282_v35 = vpop.trf.xlu0 }
 0x257   :  { %v344_v36 = vsub.f32 %v282_v35, %v564_v34 }
 0x259   :  { %v347_v38 = vsel %vm346_vm1, %v344_v36, -inf }
 0x25a   :  { %348 = vmax.xlane.f32.xlu1 %v347_v38  ;;  %v314_v39 = vpop.trf.xlu0 }
 0x25b   :  { %v345_v40 = vsub.f32 %v314_v39, %v565_v37 }
 0x25d   :  { %v350_v41 = vsel %vm346_vm1, %v345_v40, -inf }
 0x25e   :  { %351 = vmax.xlane.f32.xlu1 %v350_v41 }
 0x2e7   :  { %v349_v42 = vpop.xlane.xlu1 %348 }
 0x2e8   :  { %v353_v43 = vsub.f32 %v344_v36, %v349_v42 }
 0x2ea   :  { %v355_v44 = vmul.f32 1.442695, %v353_v43 }
 0x2eb   :  { %v352_v45 = vpop.xlane.xlu1 %351 }
 0x2ec   :  { %649 = vpow2.f32 %v355_v44  ;;  %v354_v46 = vsub.f32 %v345_v40, %v352_v45 }
 0x2ee   :  { %v357_v47 = vmul.f32 1.442695, %v354_v46 }
 0x2f0   :  { %651 = vpow2.f32 %v357_v47 }
 0x2f6   :  { %v650_v48 = vpop.eup %649 }
 0x2f7   :  { %v359_v49 = vsel %vm346_vm1, %v650_v48, 0.0 }
 0x2f8   :  { %360 = vadd.xlane.f32.xlu0 %v359_v49 }
 0x2fa   :  { %v652_v50 = vpop.eup %651 }
 0x2fb   :  { %v362_v51 = vsel %vm346_vm1, %v652_v50, 0.0 }
 0x2fc   :  { %363 = vadd.xlane.f32.xlu1 %v362_v51 }
 0x385   :  { %v361_v53 = vpop.xlane.xlu0 %360 }
 0x386   :  { %653 = vrcp.f32 %v361_v53 }
 0x389   :  { %v364_v54 = vpop.xlane.xlu1 %363 }
 0x38a   :  { %655 = vrcp.f32 %v364_v54 }
 0x390   :  { %v654_v55 = vpop.eup %653 }
 0x391   :  { %v367_v56 = vmul.f32 %v654_v55, %v361_v53 }
 0x393   :  { %v369_v57 = vsub.f32 2.0, %v367_v56 }
 0x394   :  { %v656_v58 = vpop.eup %655 }
 0x395   :  { %v371_v59 = vmul.f32 %v654_v55, %v369_v57  ;;  %v368_v60 = vmul.f32 %v656_v58, %v364_v54 }
 0x397   :  { %v373_v61 = vmul.f32 %v650_v48, %v371_v59  ;;  %v370_v62 = vsub.f32 2.0, %v368_v60 }
 0x399   :  { %525 = vst.msk [vmem:[#allocation6] sm:$0x3] %vm346_vm1, %v373_v61  ;;  %v372_v63 = vmul.f32 %v656_v58, %v370_v62  ;;  %609 = vmatmul.mubr.msk.f32.vlgmr.msra.gmra.mrb[2].mxu0 %vm375_vm3, %v373_v61 }
 0x39b   :  { %v374_v0 = vmul.f32 %v652_v50, %v372_v63 }
 0x39d   :  { %526 = vst.msk [vmem:[#allocation6 + $0x2] sm:$0x3] %vm346_vm1, %v374_v0  ;;  %614 = vmatmul.mubr.msk.f32.vlgmr.msra.gmra.mrb[2].mxu1 %vm375_vm3, %v374_v0 }
 0x39e   :  { %694 = shalt.err (!%p691_p12)
}
 0x39f   :  { %s695_s30 = scalar_lea.hbm %s861_s5, 64 }
 0x3a0   :  { %p696_p13 = scmp.ne.s32.totalorder %s861_s5, %s695_s30  ;;  %p699_p0 = scmp.lt.u32.totalorder %s695_s30, %s861_s5 }
 0x3a2   :  { %p701_p1 = pnand %p699_p0, %p696_p13 }
 0x3a4   :  { %704 = shalt.err (!%p701_p1)
}
 0x3a5   :  { %550 = dma.vmem_to_hbm [thread:$0]  %s545_s24, 64, %s861_s5, [#allocation7], %s734_s28, %s734_s28, %s735_s29   ;;  %vm522_vm4 = vcmask 254976  }
 0x3a6   :  { %s740_s12 = smov [#allocation5]  }
 0x3a7   :  { %s532_s0 = sshll.u32 %s740_s12, 4  ;;  %s533_s0 = int_to_ptr.vmem [resolvable:$true] %s532_s0 }
 0x3a8   :  { %s705_s13 = scalar_lea.vmem %s533_s0, 64  ;;  %p710_p3 = scmp.lt.s32.totalorder %s533_s0, %s533_s0 }
 0x3a9   :  { %p706_p2 = scmp.ne.s32.totalorder %s533_s0, %s705_s13  ;;  %p711_p4 = scmp.lt.s32.totalorder %s705_s13, %s705_s13 }
 0x3ab   :  { %p712_p5 = por %p711_p4, %p710_p3 }
 0x3ad   :  { %p713_p6 = pnand %p712_p5, %p706_p2 }
 0x46c   :  { %v445_v1 = vpop.f32.mrb[2].mxu0 }
 0x46d   :  { %523 = vst.msk [vmem:[#allocation5] sm:$0x3] %vm522_vm4, %v445_v1  ;;  %v610_v2 = vpop.f32.mrb[3].mxu0 }
 0x470   :  { %v518_v3 = vpop.f32.mrb[2].mxu1 }
 0x471   :  { %524 = vst.msk [vmem:[#allocation5 + $0x2] sm:$0x3] %vm522_vm4, %v518_v3  ;;  %v615_v4 = vpop.f32.mrb[3].mxu1 }
 0x472   :  { %716 = shalt.err (!%p713_p6)
}
 0x473   :  { %s717_s5 = scalar_lea.hbm %s860_s4, 64 }
 0x474   :  { %p718_p7 = scmp.ne.s32.totalorder %s860_s4, %s717_s5  ;;  %p721_p8 = scmp.lt.u32.totalorder %s717_s5, %s860_s4 }
 0x476   :  { %p723_p9 = pnand %p721_p8, %p718_p7 }
 0x478   :  { %726 = shalt.err (!%p723_p9)
}
 0x479   :  { %538 = dma.vmem_to_hbm [thread:$0]  %s533_s0, 64, %s860_s4, [#allocation4], %s734_s28, %s734_s28, %s735_s29  }
 0x47a   :  { %729 = dma.done.wait [#allocation4], 64  }
 0x47b   :  { %730 = vsyncadd [#allocation4], 4294967232 }
 0x47c   :  { %731 = dma.done.wait [#allocation7], 64  }
 0x47d   :  { %732 = vsyncadd [#allocation7], 4294967232 }
 0x47e   :  { %557 = vsyncpa [#allocation3], 1 }
 0x47f   :  { %558 = vsyncpa [#allocation4], 1 }
 0x480   :  { %559 = vsyncpa [#allocation7], 1 }

</bundles_post_ra>
